<compile_context>
chip_gen: v7x
topology: tpu7x:2x2x1
jax: 0.10.0
libtpu: 0.0.40
codegen_flags: <defaults>
</compile_context>

<pallas_src>
import functools

import jax
import jax.numpy as jnp
from jax.experimental import pallas as pl
from jax.experimental.pallas import tpu as pltpu


def _rope_kernel_single_roll(dh, x_ref, cos_ref, sin_ref, o_ref):
    # x_ref: (TBH, TS, D) block; tables (TS, D) f32, resident across the grid.
    # W == D here, so one lane roll by dh yields the rotate-half partner for
    # every lane; the +/- sign lives in the precomputed sin table.
    x = x_ref[...].astype(jnp.float32)
    partner = pltpu.roll(x, shift=dh, axis=x.ndim - 1)
    o_ref[...] = (x * cos_ref[...] + partner * sin_ref[...]).astype(o_ref.dtype)


def _rope_kernel_two_roll(dh, x_ref, cos_ref, sina_ref, sinb_ref, o_ref):
    # Lane-folded layout (W = r*D > D): two rolls provide the partners for the
    # first / second half of every D-chunk; cross-chunk wrap contamination is
    # multiplied by the zero half of the corresponding sin table.
    x = x_ref[...].astype(jnp.float32)
    w = x_ref.shape[-1]
    last = x.ndim - 1
    part_hi = pltpu.roll(x, shift=w - dh, axis=last)  # lane i <- x[i + dh]
    part_lo = pltpu.roll(x, shift=dh, axis=last)      # lane i <- x[i - dh]
    o = x * cos_ref[...] + part_hi * sina_ref[...] + part_lo * sinb_ref[...]
    o_ref[...] = o.astype(o_ref.dtype)


def rotary_positional_embedding(x, dim, base=10000.0):
    """RoPE forward matching the PyTorch module. x: (B, H, S, D) with D == dim."""
    B, H, S, D = x.shape
    assert D == dim and D % 2 == 0
    dh = D // 2

    # Parameter-free table setup (mirrors torch __init__/forward). Stays f32.
    inv_freq = 1.0 / (base ** (jnp.arange(0, D, 2, dtype=jnp.float32) / D))  # (dh,)
    t = jnp.arange(S, dtype=jnp.float32)                                     # (S,)
    freqs = t[:, None] * inv_freq[None, :]                                   # (S, dh)
    cos_h = jnp.cos(freqs)
    sin_h = jnp.sin(freqs)
    cos_full = jnp.concatenate([cos_h, cos_h], axis=-1)                      # (S, D)

    # Lane-dense folding: pack r consecutive positions along the last dim
    # (contiguous reshape only) so the lane axis is >= 128 wide when D < 128.
    r = 1
    if D < 128 and 128 % D == 0 and S % (128 // D) == 0:
        r = 128 // D
    Sr, W = S // r, r * D

    BH = B * H
    x_f = x.reshape(BH, Sr, W)

    if r == 1:
        sin_signed = jnp.concatenate([-sin_h, sin_h], axis=-1)               # (S, D)
        tables = (cos_full.reshape(Sr, W), sin_signed.reshape(Sr, W))
        kernel = functools.partial(_rope_kernel_single_roll, dh)
    else:
        zeros = jnp.zeros_like(sin_h)
        sin_a = jnp.concatenate([-sin_h, zeros], axis=-1)  # active on first halves
        sin_b = jnp.concatenate([zeros, sin_h], axis=-1)   # active on second halves
        tables = (cos_full.reshape(Sr, W), sin_a.reshape(Sr, W),
                  sin_b.reshape(Sr, W))
        kernel = functools.partial(_rope_kernel_two_roll, dh)

    # --- Tiling -------------------------------------------------------------
    # Target ~2 MiB (f32-equivalent) x blocks: flat part of the HBM roofline,
    # and double-buffered in+out stays far below every chip's VMEM budget.
    elem_bytes = 4
    cap = 2 << 20

    if Sr * W * elem_bytes <= cap:
        tsr = Sr
    else:
        # A seq tile smaller than Sr must be a multiple of 8 (sublane rule).
        divs = [d for d in range(8, Sr, 8)
                if Sr % d == 0 and d * W * elem_bytes <= cap]
        tsr = max(divs) if divs else Sr
    n_s = Sr // tsr

    row_cap = max(1, cap // (tsr * W * elem_bytes))
    divisors = [d for d in range(1, BH + 1) if BH % d == 0]
    cands = [d for d in divisors if d <= row_cap and (BH // d) * n_s >= 2]
    if not cands:
        cands = [d for d in divisors if d <= row_cap] or [1]
    tbh = max(cands)
    grid = (BH // tbh, n_s)

    x_spec = pl.BlockSpec((tbh, tsr, W), lambda i, j: (i, j, 0))
    tab_spec = pl.BlockSpec((tsr, W), lambda i, j: (j, 0))

    out_f = pl.pallas_call(
        kernel,
        out_shape=jax.ShapeDtypeStruct((BH, Sr, W), x.dtype),
        grid_spec=pltpu.PrefetchScalarGridSpec(
            num_scalar_prefetch=0,
            grid=grid,
            in_specs=[x_spec] + [tab_spec] * len(tables),
            out_specs=x_spec,
        ),
        compiler_params=pltpu.CompilerParams(
            dimension_semantics=("parallel", "parallel"),
            vmem_limit_bytes=32 * 1024 * 1024,  # safe on v5e/v6e/v7x
        ),
    )(x_f, *tables)

    return out_f.reshape(B, H, S, D)


def _rope_reference(x, dim, base=10000.0):
    # Pure-JAX reference mirroring the PyTorch forward exactly.
    inv_freq = 1.0 / (base ** (jnp.arange(0, dim, 2, dtype=jnp.float32) / dim))
    t = jnp.arange(x.shape[2], dtype=jnp.float32)
    freqs = jnp.einsum("i,j->ij", t, inv_freq)
    emb = jnp.concatenate([freqs, freqs], axis=-1)
    cos = jnp.cos(emb[:, : dim // 2]).reshape(1, 1, -1, dim // 2)
    sin = jnp.sin(emb[:, : dim // 2]).reshape(1, 1, -1, dim // 2)
    x1, x2 = x[..., : dim // 2], x[..., dim // 2 :]
    return jnp.concatenate([x1 * cos - x2 * sin, x2 * cos + x1 * sin], axis=-1)


if __name__ == "__main__":
    B, H, S, D = 2, 4, 8, 32  # dim = 32
    key = jax.random.PRNGKey(0)
    x = jax.random.normal(key, (B, H, S, D), dtype=jnp.float32)

    out = rotary_positional_embedding(x, dim=D)
    out = jax.block_until_ready(out)

    ref = _rope_reference(x, dim=D)
    assert out.shape == x.shape and out.dtype == x.dtype
    assert jnp.allclose(out, ref, atol=1e-5, rtol=1e-5)

    print("KERNEL_OK")
</pallas_src>

<mosaic_0001>
module attributes {stable_mosaic.version = 11 : i64} {
  func.func @_rope_kernel_two_roll(%arg0: i32, %arg1: i32, %arg2: memref<4x2x128xf32, #tpu.memory_space<vmem>>, %arg3: memref<2x128xf32, #tpu.memory_space<vmem>>, %arg4: memref<2x128xf32, #tpu.memory_space<vmem>>, %arg5: memref<2x128xf32, #tpu.memory_space<vmem>>, %arg6: memref<4x2x128xf32, #tpu.memory_space<vmem>>) attributes {dimension_semantics = [#tpu.dimension_semantics<parallel>, #tpu.dimension_semantics<parallel>], iteration_bounds = array<i64: 2, 1>, scalar_prefetch = 0 : i64, scratch_operands = 0 : i64, tpu.core_type = #tpu.core_type<tc>, window_params = [{transform_indices = @transform_0, window_bounds = array<i64: 4, 2, 128>}, {transform_indices = @transform_1, window_bounds = array<i64: 2, 128>}, {transform_indices = @transform_2, window_bounds = array<i64: 2, 128>}, {transform_indices = @transform_3, window_bounds = array<i64: 2, 128>}, {transform_indices = @transform_4, window_bounds = array<i64: 4, 2, 128>}]} {
    %c0 = arith.constant 0 : index
    %c0_0 = arith.constant 0 : index
    %c0_1 = arith.constant 0 : index
    %0 = vector.load %arg2[%c0, %c0_0, %c0_1] : memref<4x2x128xf32, #tpu.memory_space<vmem>>, vector<4x2x128xf32>
    %c112_i32 = arith.constant 112 : i32
    %1 = tpu.dynamic_rotate %0 by %c112_i32 dim 2 : vector<4x2x128xf32>, i32 -> vector<4x2x128xf32>
    %c16_i32 = arith.constant 16 : i32
    %2 = tpu.dynamic_rotate %0 by %c16_i32 dim 2 : vector<4x2x128xf32>, i32 -> vector<4x2x128xf32>
    %c0_2 = arith.constant 0 : index
    %c0_3 = arith.constant 0 : index
    %3 = vector.load %arg3[%c0_2, %c0_3] : memref<2x128xf32, #tpu.memory_space<vmem>>, vector<2x128xf32>
    %4 = vector.shape_cast %3 : vector<2x128xf32> to vector<1x2x128xf32>
    %5 = vector.broadcast %4 : vector<1x2x128xf32> to vector<4x2x128xf32>
    %6 = arith.mulf %0, %5 : vector<4x2x128xf32>
    %c0_4 = arith.constant 0 : index
    %c0_5 = arith.constant 0 : index
    %7 = vector.load %arg4[%c0_4, %c0_5] : memref<2x128xf32, #tpu.memory_space<vmem>>, vector<2x128xf32>
    %8 = vector.shape_cast %7 : vector<2x128xf32> to vector<1x2x128xf32>
    %9 = vector.broadcast %8 : vector<1x2x128xf32> to vector<4x2x128xf32>
    %10 = arith.mulf %1, %9 : vector<4x2x128xf32>
    %11 = arith.addf %6, %10 : vector<4x2x128xf32>
    %c0_6 = arith.constant 0 : index
    %c0_7 = arith.constant 0 : index
    %12 = vector.load %arg5[%c0_6, %c0_7] : memref<2x128xf32, #tpu.memory_space<vmem>>, vector<2x128xf32>
    %13 = vector.shape_cast %12 : vector<2x128xf32> to vector<1x2x128xf32>
    %14 = vector.broadcast %13 : vector<1x2x128xf32> to vector<4x2x128xf32>
    %15 = arith.mulf %2, %14 : vector<4x2x128xf32>
    %16 = arith.addf %11, %15 : vector<4x2x128xf32>
    %c0_8 = arith.constant 0 : index
    %c0_9 = arith.constant 0 : index
    %c0_10 = arith.constant 0 : index
    %17 = vector.load %arg6[%c0_8, %c0_9, %c0_10] : memref<4x2x128xf32, #tpu.memory_space<vmem>>, vector<4x2x128xf32>
    tpu.vector_store %arg6[%c0_8, %c0_9, %c0_10], %16 {strides = array<i32>} : memref<4x2x128xf32, #tpu.memory_space<vmem>>, vector<4x2x128xf32>,
    return
  }
  func.func @transform_0(%arg0: i32, %arg1: i32) -> (i32, i32, i32) {
    %c0_i32 = arith.constant 0 : i32
    %c0_i32_0 = arith.constant 0 : i32
    return %arg0, %arg1, %c0_i32 : i32, i32, i32
  }
  func.func @transform_1(%arg0: i32, %arg1: i32) -> (i32, i32) {
    %c0_i32 = arith.constant 0 : i32
    %c0_i32_0 = arith.constant 0 : i32
    return %arg1, %c0_i32 : i32, i32
  }
  func.func @transform_2(%arg0: i32, %arg1: i32) -> (i32, i32) {
    %c0_i32 = arith.constant 0 : i32
    %c0_i32_0 = arith.constant 0 : i32
    return %arg1, %c0_i32 : i32, i32
  }
  func.func @transform_3(%arg0: i32, %arg1: i32) -> (i32, i32) {
    %c0_i32 = arith.constant 0 : i32
    %c0_i32_0 = arith.constant 0 : i32
    return %arg1, %c0_i32 : i32, i32
  }
  func.func @transform_4(%arg0: i32, %arg1: i32) -> (i32, i32, i32) {
    %c0_i32 = arith.constant 0 : i32
    %c0_i32_0 = arith.constant 0 : i32
    return %arg0, %arg1, %c0_i32 : i32, i32, i32
  }
}

</mosaic_0001>

<bundles_post_ra>
// kernel: tpu_custom_call.1
= control target key start
LH: loop header
LB: loop body
LE: loop exit
PB: predicated region body
PF: predicated region fallthrough
CT: control target
= control target key end

     0   :  { %9 = vsyncpa [#allocation3], 0  ;;  %s901_s0 = inlined_call_operand.hbm [shape: f32[8,2,128], index: 0, kind: input, shape index: {}]   ;;  %s902_s1 = inlined_call_operand.vmem [shape: f32[2,128], index: 1, kind: input, shape index: {}]   ;;  %s903_s2 = inlined_call_operand.vmem [shape: f32[2,128], index: 2, kind: input, shape index: {}]   ;;  %s904_s3 = inlined_call_operand.vmem [shape: f32[2,128], index: 3, kind: input, shape index: {}]   ;;  %s905_s4 = inlined_call_operand.hbm [shape: f32[8,2,128], index: 4, kind: output, shape index: {}]  }
   0x1   :  { %11 = vsyncpa [#allocation3 + $0x1], 0 }
   0x2   :  { %12 = vsyncpa [#allocation4], 0 }
   0x3   :  { %14 = vsyncpa [#allocation4 + $0x1], 0  ;;  %s713_s15 = smov 0   ;;  %s715_s16 = smov 0  }
   0x4   :  { %s717_s17 = smov 0   ;;  %s719_s18 = smov 0  }
   0x5   :  { %s721_s19 = smov 0   ;;  %s723_s20 = smov 0  }
   0x6 LB: > { %s478_s21 = sadd.s32 4294967295, %s678_s20   ;;  %s479_s22 = sadd.s32 4294967294, %s678_s20   ;;  %s678_s20 = sphi %s723_s20, %s20_s20   ;;  %s674_s19 = sphi %s721_s19, %s920_s19   ;;  %s670_s18 = sphi %s719_s18, %s919_s18   ;;  %s666_s17 = sphi %s717_s17, %s918_s17   ;;  %s662_s16 = sphi %s715_s16, %s917_s16   ;;  %s658_s15 = sphi %s713_s15, %s916_s15  }
   0x7   : > { %s32_s23 = sadd.s32 1, %s674_s19  ;;  %s41_s24 = sadd.s32 1, %s666_s17 }
   0x8   : > { %p34_p0 = scmp.ge.s32.totalorder %s32_s23, 2  ;;  %p48_p1 = scmp.ne.s32.totalorder %s666_s17, %s662_s16 }
   0x9   : > { %p49_p2 = scmp.eq.s32.totalorder %s678_s20, 0  ;;  %p54_p3 = scmp.ne.s32.totalorder %s662_s16, %s658_s15 }
   0xa   : > { %s922_s23 = smov (%p34_p0, %s32_s23), 0  ;;  %p55_p5 = scmp.eq.s32.totalorder %s478_s21, 0 }
   0xb   : > { %p754_p4 = por %p49_p2, %p48_p1  ;;  %s36_s26 = ssub.s32 %s674_s19, %s922_s23 }
   0xc   : > { %p158_p6 = scmp.eq.s32.totalorder %s478_s21, 1  ;;  %p39_p7 = scmp.eq.s32.totalorder %s36_s26, 0 }
   0xd   : > { %p760_p8 = por %p55_p5, %p54_p3  ;;  %p164_p10 = scmp.eq.s32.totalorder %s479_s22, 1 }
   0xe   : > { %p764_p9 = por %p158_p6, %p48_p1  ;;  %p510_p13 = scmp.lt.s32.totalorder %s678_s20, 2 }
   0xf   : > { %s769_s29 = scalar_select %p39_p7, %s666_s17, %s41_s24  }
  0x10   : > { %s909_s28 = scalar_select %p764_p9, 1, 0 }
  0x11   : > { %p771_p11 = por %p164_p10, %p54_p3  ;;  %s205_s5 = sand.u32 1, %s666_s17  }
  0x12   : > { %s485_s6 = sshll.u32 %s205_s5, 3  ;;  %s496_s7 = sshll.u32 %s674_s19, 7 }
  0x13   : > { %s910_s30 = scalar_select %p771_p11, 1, 0 }
  0x14   : > { %s782_s10 = scalar_lea.hbm %s901_s0, %s496_s7  ;;  %s209_s11 = scalar_lea.vmem [#allocation2], %s485_s6 }
  0x15   : > { %s217_s12 = sshll.u32 %s209_s11, 4  ;;  %p788_p0 = pnand %p510_p13, %p754_p4  ;;  %s784_s12 = int_to_ptr.vmem [resolvable:$true] %s217_s12 }
  0x16   : > { %s793_s14 = scalar_lea.sflag [#allocation3], %s205_s5  ;;  %s566_s21 = scalar_lea.hbm %s782_s10, 128 }
  0x17   : > { %p567_p2 = scmp.ne.s32.totalorder %s782_s10, %s566_s21  ;;  %p568_p3 = pneg %p788_p0 }
  0x18   : > { %s571_s25 = scalar_lea.hbm %s901_s0, 256  ;;  %p572_p4 = scmp.lt.u32.totalorder %s782_s10, %s901_s0 }
  0x19   : > { %p569_p5 = pnand %p568_p3, %p567_p2  ;;  %p573_p7 = scmp.lt.u32.totalorder %s571_s25, %s566_s21 }
  0x1a   : > { %p575_p13 = scmp.lt.u32.totalorder %s566_s21, %s782_s10 }
  0x1b   : > { %p570_p6 = pneg %p569_p5  ;;  %p574_p10 = por %p573_p7, %p572_p4 }
  0x1d   : > { %p576_p12 = por %p575_p13, %p574_p10 }
  0x1f   : > { %p577_p1 = pnand %p576_p12, %p570_p6 }
  0x21   : > { %580 = shalt.err (!%p577_p1)
}
  0x22   : > { %s581_s5 = scalar_lea.vmem %s784_s12, 128  ;;  %s680_s7 = smov [#allocation2]  }
  0x23   : > { %p582_p2 = scmp.ne.s32.totalorder %s784_s12, %s581_s5  ;;  %s586_s8 = sshll.u32 %s680_s7, 4  ;;  %s587_s8 = int_to_ptr.vmem [resolvable:$false] %s586_s8 }
  0x24   : > { %s588_s9 = scalar_lea.vmem %s587_s8, 256  ;;  %p589_p9 = scmp.lt.s32.totalorder %s784_s12, %s587_s8 }
  0x25   : > { %p584_p5 = pnand %p582_p2, %p568_p3  ;;  %p590_p4 = scmp.lt.s32.totalorder %s588_s9, %s581_s5 }
  0x27   : > { %p585_p11 = pneg %p584_p5  ;;  %p591_p7 = por %p590_p4, %p589_p9 }
  0x29   : > { %p592_p10 = pnand %p591_p7, %p585_p11 }
  0x2b   : > { %595 = shalt.err (!%p592_p10)
}
  0x2c   : > { %s681_s11 = smov 32   ;;  %s682_s21 = smov 2  }
  0x2d   : > { %505 = dma.hbm_to_vmem [thread:$0]  (!%p788_p0), %s782_s10, 128, %s784_s12, %s793_s14, %s681_s11, %s681_s11, %s682_s21  }
  0x2e   : > { %p225_p12 = scmp.lt.s32.totalorder %s678_s20, 3  ;;  %p912_p1 = scmp.ge.s32.totalorder %s678_s20, 1 }
  0x30   : > { %p226_p3 = pnand %p912_p1, %p225_p12 }
  0x31   : > { %s825_s22 = sand.u32 (!%p226_p3), 1, %s662_s16  }
  0x32   : > { %229 = sbr.rel (%p226_p3) target bundleno = 205 (0xcd), region = 36  ;;  %s489_s24 = sshll.u32 (!%p226_p3), %s825_s22, 3 }
  0x33   : > { %s232_s25 = scalar_lea.sflag (!%p226_p3), [#allocation3], %s825_s22  ;;  %s235_s26 = scalar_lea.vmem (!%p226_p3), [#allocation2], %s489_s24 }
  0x39   : > { %649 = dma.done.wait (%p760_p8), %s232_s25, 128  }
  0x3a   : > { %651 = vsyncadd (%p760_p8), %s232_s25, 4294967168  ;;  %v288_v0 = vld [vmem:[%s235_s26 + $0x4] sm:$0x3]  ;;  %v286_v1 = vld [vmem:[%s235_s26] sm:$0x3]  ;;  %s683_s10 = smov 112  }
  0x3b   : > { %294 = vrot.lane.b32.xlu1 %v288_v0, %s683_s10  ;;  %290 = vrot.lane.b32.xlu0 %v286_v1, %s683_s10  ;;  %v289_v2 = vld [vmem:[%s235_s26 + $0x6] sm:$0x3]  ;;  %v287_v3 = vld [vmem:[%s235_s26 + $0x2] sm:$0x3]  ;;  %s684_s12 = smov 16   ;;  %s271_s8 = scalar_lea.vmem [#allocation5], %s489_s24 }
  0x3c   : > { %v306_v6 = vld [vmem:[%s902_s1] sm:$0x3]  ;;  %s348_s9 = sshll.u32 %s271_s8, 4  ;;  %s497_s11 = sshll.u32 %s670_s18, 7  ;;  %s847_s9 = int_to_ptr.vmem [resolvable:$true] %s348_s9 }
  0x3d   : > { %v311_v7 = vld [vmem:[%s903_s2] sm:$0x3]  ;;  %v307_v8 = vmul.f32 %v306_v6, %v286_v1  ;;  %v308_v12 = vmul.f32 %v306_v6, %v287_v3  ;;  %v309_v15 = vmul.f32 %v306_v6, %v288_v0  ;;  %v310_v16 = vmul.f32 %v306_v6, %v289_v2  ;;  %s852_s25 = scalar_lea.hbm %s905_s4, %s497_s11  ;;  %s334_s18 = scalar_lea.sflag [#allocation4], %s825_s22 }
  0x3e   : > { %v320_v14 = vld [vmem:[%s904_s3] sm:$0x3]  ;;  %s596_s26 = scalar_lea.vmem %s847_s9, 128  ;;  %p913_p9 = scmp.ne.s32.totalorder %s909_s28, 0 }
  0x3f   : > { %296 = vrot.lane.b32.xlu1 %v289_v2, %s683_s10  ;;  %292 = vrot.lane.b32.xlu0 %v287_v3, %s683_s10  ;;  %p597_p8 = scmp.ne.s32.totalorder %s847_s9, %s596_s26  ;;  %s685_s10 = smov [#allocation5]  }
  0x41   : > { %p598_p11 = pnand %p597_p8, %p913_p9 }
  0x43   : > { %300 = vrot.lane.b32.xlu1 %v287_v3, %s684_s12  ;;  %298 = vrot.lane.b32.xlu0 %v286_v1, %s684_s12  ;;  %p599_p0 = pneg %p598_p11 }
  0x47   : > { %304 = vrot.lane.b32.xlu1 %v289_v2, %s684_s12  ;;  %302 = vrot.lane.b32.xlu0 %v288_v0, %s684_s12  ;;  %s600_s12 = sshll.u32 %s685_s10, 4  ;;  %s601_s12 = int_to_ptr.vmem [resolvable:$false] %s600_s12 }
  0x48   : > { %s602_s13 = scalar_lea.vmem %s601_s12, 256  ;;  %p603_p6 = scmp.lt.s32.totalorder %s847_s9, %s601_s12 }
  0x49   : > { %p604_p13 = scmp.lt.s32.totalorder %s602_s13, %s596_s26 }
  0x4b   : > { %p605_p2 = por %p604_p13, %p603_p6 }
  0x4d   : > { %p606_p5 = pnand %p605_p2, %p599_p0 }
  0xad   : > { %v295_v4 = vpop.permute.xlu1 %294  ;;  %v291_v5 = vpop.permute.xlu0 %290 }
  0xae   : > { %v312_v9 = vmul.f32 %v311_v7, %v291_v5  ;;  %v314_v17 = vmul.f32 %v311_v7, %v295_v4 }
  0xb0   : > { %v316_v18 = vadd.f32 %v312_v9, %v307_v8  ;;  %v318_v29 = vadd.f32 %v314_v17, %v309_v15 }
  0xb1   : > { %v297_v10 = vpop.permute.xlu1 %296  ;;  %v293_v11 = vpop.permute.xlu0 %292 }
  0xb2   : > { %v313_v13 = vmul.f32 %v311_v7, %v293_v11  ;;  %v315_v21 = vmul.f32 %v311_v7, %v297_v10 }
  0xb4   : > { %v317_v22 = vadd.f32 %v313_v13, %v308_v12  ;;  %v319_v30 = vadd.f32 %v315_v21, %v310_v16 }
  0xb5   : > { %v301_v19 = vpop.permute.xlu1 %300  ;;  %v299_v20 = vpop.permute.xlu0 %298 }
  0xb6   : > { %v322_v23 = vmul.f32 %v320_v14, %v301_v19  ;;  %v321_v24 = vmul.f32 %v320_v14, %v299_v20 }
  0xb8   : > { %v326_v25 = vadd.f32 %v322_v23, %v317_v22  ;;  %v325_v26 = vadd.f32 %v321_v24, %v316_v18 }
  0xb9   : > { %v305_v27 = vpop.permute.xlu1 %304  ;;  %v303_v28 = vpop.permute.xlu0 %302 }
  0xba   : > { %330 = vst [vmem:[%s271_s8 + $0x2] sm:$0x3] %v326_v25  ;;  %329 = vst [vmem:[%s271_s8] sm:$0x3] %v325_v26  ;;  %v324_v31 = vmul.f32 %v320_v14, %v305_v27  ;;  %v323_v32 = vmul.f32 %v320_v14, %v303_v28 }
  0xbc   : > { %v328_v33 = vadd.f32 %v324_v31, %v319_v30  ;;  %v327_v34 = vadd.f32 %v323_v32, %v318_v29 }
  0xbe   : > { %332 = vst [vmem:[%s271_s8 + $0x6] sm:$0x3] %v328_v33  ;;  %331 = vst [vmem:[%s271_s8 + $0x4] sm:$0x3] %v327_v34 }
  0xbf   : > { %609 = shalt.err (!%p606_p5)
}
  0xc0   : > { %s610_s14 = scalar_lea.hbm %s852_s25, 128  ;;  %s614_s5 = scalar_lea.hbm %s905_s4, 256 }
  0xc1   : > { %p611_p4 = scmp.ne.s32.totalorder %s852_s25, %s610_s14  ;;  %p615_p12 = scmp.lt.u32.totalorder %s852_s25, %s905_s4 }
  0xc2   : > { %p616_p1 = scmp.lt.u32.totalorder %s614_s5, %s610_s14  ;;  %p618_p8 = scmp.lt.u32.totalorder %s610_s14, %s852_s25 }
  0xc3   : > { %p612_p7 = pnand %p611_p4, %p913_p9 }
  0xc4   : > { %p617_p3 = por %p616_p1, %p615_p12 }
  0xc5   : > { %p613_p10 = pneg %p612_p7 }
  0xc6   : > { %p619_p11 = por %p618_p8, %p617_p3 }
  0xc8   : > { %p620_p0 = pnand %p619_p11, %p613_p10 }
  0xca   : > { %623 = shalt.err (!%p620_p0)
}
  0xcb   : > { %s686_s11 = smov 32   ;;  %s687_s21 = smov 2  }
  0xcc   : > { %500 = dma.vmem_to_hbm [thread:$0]  (%p913_p9), %s847_s9, 128, %s852_s25, %s334_s18, %s686_s11, %s686_s11, %s687_s21  }
  0xcd PF: > { %s363_s24 = sand.u32 1, %s658_s15   ;;  %p914_p6 = scmp.ne.s32.totalorder %s910_s30, 0 }
  0xce   : > { %p915_p13 = scmp.ge.s32.totalorder %s678_s20, 2  ;;  %s364_s26 = scalar_lea.sflag [#allocation4], %s363_s24 }
  0xd0   : > { %p507_p2 = pnand %p915_p13, %p914_p6 }
  0xd2   : > { %653 = dma.done.wait (!%p507_p2), %s364_s26, 128  }
  0xd3   : > { %655 = vsyncadd (!%p507_p2), %s364_s26, 4294967168  ;;  %s20_s20 = sadd.s32 1, %s678_s20   ;;  %s916_s15 = smov %s662_s16 }
  0xd4   : > { %p17_p5 = scmp.ge.s32.totalorder %s20_s20, 4   ;;  %s917_s16 = smov %s666_s17 }
  0xd5   : > { %s918_s17 = smov %s769_s29  ;;  %s919_s18 = smov %s674_s19 }
  0xd6   : > { %s920_s19 = smov %s922_s23  ;;  %19 = sbr.rel (!%p17_p5) target bundleno = 6 (0x6), region = 90 }
  0xdd   :  { %369 = vsyncpa [#allocation3], 1 }
  0xde   :  { %371 = vsyncpa [#allocation3 + $0x1], 1 }
  0xdf   :  { %372 = vsyncpa [#allocation4], 1 }
  0xe0   :  { %374 = vsyncpa [#allocation4 + $0x1], 1 }

</bundles_post_ra>
